<compile_context>
chip_gen: v5e
topology: v5e:2x2
jax: 0.10.0
libtpu: 0.0.40
codegen_flags: <defaults>
</compile_context>

<pallas_src>
import jax
import jax.numpy as jnp
from jax import lax
from jax.experimental import pallas as pl
from jax.experimental.pallas import tpu as pltpu
import numpy as np


def downblock2d(x_nchw, w_oihw, bias, gamma, beta):
    """x_nchw: (B, Cin, H, W). Returns (B, Cout, H//2, W//2) float32 (NCHW)."""
    B, Cin, H, W = x_nchw.shape
    Cout, _, KH, KW = w_oihw.shape
    assert H % 2 == 0 and W % 2 == 0
    pad = 1
    Hp, Wp = H + 2 * pad, W + 2 * pad
    HpWp = Hp * Wp
    H2, W2 = H // 2, W // 2
    Q = H2 * W2

    # Pad Cin up to a sublane multiple so the in-kernel im2col concat stacks
    # aligned (8, lanes) tiles.  Lane-pad the flattened spatial axis so every
    # (kh,kw) shifted window of width Hp*Wp is a plain static slice.
    Cin_p = ((Cin + 7) // 8) * 8
    Kc = KH * KW * Cin_p
    max_shift = (KH - 1) * Wp + (KW - 1)
    Lp = ((HpWp + max_shift + 127) // 128) * 128

    xf = x_nchw.astype(jnp.float32)
    x_sp = jnp.pad(xf, ((0, 0), (0, 0), (pad, pad), (pad, pad)))      # (B,Cin,Hp,Wp)
    x_flat = x_sp.reshape(B, Cin, HpWp)                               # free reshape
    x_flat = jnp.pad(x_flat, ((0, 0), (0, Cin_p - Cin), (0, Lp - HpWp)))

    # im2col weight: row index = (kh*KW + kw)*Cin_p + c   (zeros for padded c)
    wt = jnp.transpose(w_oihw, (0, 2, 3, 1)).astype(jnp.float32)      # (Cout,KH,KW,Cin)
    wt = jnp.pad(wt, ((0, 0), (0, 0), (0, 0), (0, Cin_p - Cin)))
    w2 = wt.reshape(Cout, Kc)

    g2 = gamma.reshape(Cout, 1).astype(jnp.float32)
    b2 = beta.reshape(Cout, 1).astype(jnp.float32)
    # `bias` is intentionally unused: it is cancelled by the InstanceNorm mean.

    # Host-built (numpy) constants: valid-pixel mask and pool/halo-drop matrix.
    pp = np.arange(HpWp)
    ph, pw = pp // Wp, pp % Wp
    valid = (ph < H) & (pw < W)
    mask_np = valid.astype(np.float32).reshape(1, HpWp)
    qq = np.arange(Q)
    qi, qj = qq // W2, qq % W2
    sel = (valid[:, None]
           & ((ph[:, None] // 2) == qi[None, :])
           & ((pw[:, None] // 2) == qj[None, :]))
    pool_np = np.where(sel, 0.25, 0.0).astype(np.float32)             # (HpWp, Q)
    mask = jnp.asarray(mask_np)
    pool = jnp.asarray(pool_np)

    def kernel(x_ref, w_ref, mask_ref, pool_ref, g_ref, bt_ref, o_ref):
        # x_ref    : (1, Cin_p, Lp)   channels in sublanes, flat padded spatial in lanes
        # w_ref    : (Cout, Kc)       im2col weight
        # mask_ref : (1, HpWp)        1.0 for valid (non-halo) pixels
        # pool_ref : (HpWp, Q)        0.25 where pixel p feeds pooled cell q
        # g_ref/bt_ref : (Cout, 1)    InstanceNorm gamma / beta
        # o_ref    : (1, Cout, Q)     pooled output, flat spatial in lanes
        xb = x_ref[0]                                        # (Cin_p, Lp)

        # im2col: each conv tap is a static lane shift of the flat padded image.
        pieces = []
        for kh in range(KH):
            for kw in range(KW):
                s = kh * Wp + kw
                pieces.append(xb[:, s:s + HpWp])             # (Cin_p, HpWp)
        patches = jnp.concatenate(pieces, axis=0)            # (Kc, HpWp)

        # Conv2d as a single MXU matmul (conv bias dropped: cancelled by IN).
        acc = jnp.dot(w_ref[...], patches,
                      preferred_element_type=jnp.float32)    # (Cout, HpWp)

        # InstanceNorm2d: one-pass sum / sum-of-squares over valid pixels.
        m = mask_ref[...]                                    # (1, HpWp)
        masked = acc * m
        inv_n = 1.0 / float(H * W)
        mean = jnp.sum(masked, axis=1, keepdims=True) * inv_n        # (Cout,1)
        ex2 = jnp.sum(masked * acc, axis=1, keepdims=True) * inv_n
        var = ex2 - mean * mean
        scale = g_ref[...] * lax.rsqrt(var + 1e-5)                   # (Cout,1)
        shift = bt_ref[...] - mean * scale

        # Fused affine + ReLU (single elementwise pass over the activation).
        y = jnp.maximum(acc * scale + shift, 0.0)            # (Cout, HpWp)

        # AvgPool2d(2,2) + halo drop as one MXU matmul (invalid lanes get 0 weight).
        pooled = jnp.dot(y, pool_ref[...],
                         preferred_element_type=jnp.float32)  # (Cout, Q)
        o_ref[0] = pooled.astype(o_ref.dtype)

    # NOTE: for production-scale shapes (large H*W / channels) this whole-image
    # block should be tiled over H with a 2-row halo and a two-pass InstanceNorm
    # to stay inside v7x's 64 MiB VMEM; unnecessary at these sizes.
    out = pl.pallas_call(
        kernel,
        out_shape=jax.ShapeDtypeStruct((B, Cout, Q), jnp.float32),
        grid_spec=pltpu.PrefetchScalarGridSpec(
            num_scalar_prefetch=0,
            grid=(B,),
            in_specs=[
                pl.BlockSpec((1, Cin_p, Lp), lambda b: (b, 0, 0)),
                pl.BlockSpec((Cout, Kc), lambda b: (0, 0)),
                pl.BlockSpec((1, HpWp), lambda b: (0, 0)),
                pl.BlockSpec((HpWp, Q), lambda b: (0, 0)),
                pl.BlockSpec((Cout, 1), lambda b: (0, 0)),
                pl.BlockSpec((Cout, 1), lambda b: (0, 0)),
            ],
            out_specs=pl.BlockSpec((1, Cout, Q), lambda b: (b, 0, 0)),
        ),
        compiler_params=pltpu.CompilerParams(
            dimension_semantics=("parallel",)),
    )(x_flat, w2, mask, pool, g2, b2)

    # Free reshape: output is already in NCHW channel order.
    return out.reshape(B, Cout, H2, W2)


def reference_forward(x_nchw, w_oihw, bias, gamma, beta):
    """Pure-JAX reference mirroring the PyTorch module (bias included)."""
    y = jax.lax.conv_general_dilated(
        x_nchw, w_oihw, window_strides=(1, 1), padding=[(1, 1), (1, 1)],
        dimension_numbers=("NCHW", "OIHW", "NCHW"))
    y = y + bias[None, :, None, None]
    mean = jnp.mean(y, axis=(2, 3), keepdims=True)
    var = jnp.mean((y - mean) ** 2, axis=(2, 3), keepdims=True)
    y = (y - mean) / jnp.sqrt(var + 1e-5)
    y = y * gamma[None, :, None, None] + beta[None, :, None, None]
    y = jnp.maximum(y, 0.0)
    B, C, H, W = y.shape
    y = y.reshape(B, C, H // 2, 2, W // 2, 2).mean(axis=(3, 5))
    return y


if __name__ == "__main__":
    # Small shapes consistent with the module: batch=2, in=4, out=8, spatial=16
    B, Cin, Cout, H, W = 2, 4, 8, 16, 16
    KH = KW = 3

    key = jax.random.PRNGKey(0)
    kx, kw, kb, kg, kbt = jax.random.split(key, 5)

    x = jax.random.normal(kx, (B, Cin, H, W), dtype=jnp.float32)
    w = jax.random.normal(kw, (Cout, Cin, KH, KW), dtype=jnp.float32) * 0.1
    bias = jax.random.normal(kb, (Cout,), dtype=jnp.float32) * 0.1
    gamma = 1.0 + 0.1 * jax.random.normal(kg, (Cout,), dtype=jnp.float32)
    beta = 0.1 * jax.random.normal(kbt, (Cout,), dtype=jnp.float32)

    out = jax.block_until_ready(downblock2d(x, w, bias, gamma, beta))
    ref = jax.block_until_ready(reference_forward(x, w, bias, gamma, beta))

    assert out.shape == (B, Cout, H // 2, W // 2), out.shape
    np.testing.assert_allclose(np.asarray(out), np.asarray(ref),
                               rtol=2e-3, atol=2e-3)
    print("KERNEL_OK")
</pallas_src>

<mosaic_0001>
module attributes {stable_mosaic.version = 11 : i64} {
  func.func @kernel(%arg0: i32, %arg1: memref<1x8x384xf32, #tpu.memory_space<vmem>>, %arg2: memref<8x72xf32, #tpu.memory_space<vmem>>, %arg3: memref<1x324xf32, #tpu.memory_space<vmem>>, %arg4: memref<324x64xf32, #tpu.memory_space<vmem>>, %arg5: memref<8x1xf32, #tpu.memory_space<vmem>>, %arg6: memref<8x1xf32, #tpu.memory_space<vmem>>, %arg7: memref<1x8x64xf32, #tpu.memory_space<vmem>>) attributes {dimension_semantics = [#tpu.dimension_semantics<parallel>], iteration_bounds = array<i64: 2>, scalar_prefetch = 0 : i64, scratch_operands = 0 : i64, tpu.core_type = #tpu.core_type<tc>, window_params = [{transform_indices = @transform_0, window_bounds = array<i64: 1, 8, 384>}, {pipeline_mode = #tpu.pipeline_mode<synchronous>, transform_indices = @transform_1, window_bounds = array<i64: 8, 72>}, {pipeline_mode = #tpu.pipeline_mode<synchronous>, transform_indices = @transform_2, window_bounds = array<i64: 1, 324>}, {pipeline_mode = #tpu.pipeline_mode<synchronous>, transform_indices = @transform_3, window_bounds = array<i64: 324, 64>}, {pipeline_mode = #tpu.pipeline_mode<synchronous>, transform_indices = @transform_4, window_bounds = array<i64: 8, 1>}, {pipeline_mode = #tpu.pipeline_mode<synchronous>, transform_indices = @transform_5, window_bounds = array<i64: 8, 1>}, {transform_indices = @transform_6, window_bounds = array<i64: 1, 8, 64>}]} {
    %c0 = arith.constant 0 : index
    %c0_0 = arith.constant 0 : index
    %c0_1 = arith.constant 0 : index
    %0 = vector.load %arg1[%c0, %c0_0, %c0_1] : memref<1x8x384xf32, #tpu.memory_space<vmem>>, vector<1x8x384xf32>
    %1 = vector.shape_cast %0 : vector<1x8x384xf32> to vector<8x384xf32>
    %2 = vector.extract_strided_slice %1 {offsets = [0, 0], sizes = [8, 324], strides = [1, 1]} : vector<8x384xf32> to vector<8x324xf32>
    %3 = vector.extract_strided_slice %1 {offsets = [0, 1], sizes = [8, 324], strides = [1, 1]} : vector<8x384xf32> to vector<8x324xf32>
    %4 = vector.extract_strided_slice %1 {offsets = [0, 2], sizes = [8, 324], strides = [1, 1]} : vector<8x384xf32> to vector<8x324xf32>
    %5 = vector.extract_strided_slice %1 {offsets = [0, 18], sizes = [8, 324], strides = [1, 1]} : vector<8x384xf32> to vector<8x324xf32>
    %6 = vector.extract_strided_slice %1 {offsets = [0, 19], sizes = [8, 324], strides = [1, 1]} : vector<8x384xf32> to vector<8x324xf32>
    %7 = vector.extract_strided_slice %1 {offsets = [0, 20], sizes = [8, 324], strides = [1, 1]} : vector<8x384xf32> to vector<8x324xf32>
    %8 = vector.extract_strided_slice %1 {offsets = [0, 36], sizes = [8, 324], strides = [1, 1]} : vector<8x384xf32> to vector<8x324xf32>
    %9 = vector.extract_strided_slice %1 {offsets = [0, 37], sizes = [8, 324], strides = [1, 1]} : vector<8x384xf32> to vector<8x324xf32>
    %10 = vector.extract_strided_slice %1 {offsets = [0, 38], sizes = [8, 324], strides = [1, 1]} : vector<8x384xf32> to vector<8x324xf32>
    %11 = tpu.concatenate %2, %3, %4, %5, %6, %7, %8, %9, %10 in 0 : vector<8x324xf32>, vector<8x324xf32>, vector<8x324xf32>, vector<8x324xf32>, vector<8x324xf32>, vector<8x324xf32>, vector<8x324xf32>, vector<8x324xf32>, vector<8x324xf32> -> vector<72x324xf32>
    %c0_2 = arith.constant 0 : index
    %c0_3 = arith.constant 0 : index
    %12 = vector.load %arg2[%c0_2, %c0_3] : memref<8x72xf32, #tpu.memory_space<vmem>>, vector<8x72xf32>
    %cst = arith.constant dense<0.000000e+00> : vector<8x324xf32>
    %13 = tpu.matmul %12, %11, %cst {dimension_numbers = #tpu.dot_dimension_numbers<[1], [0], [0], [1], [0, 0, 1, 1], [], []>} : vector<8x72xf32>, vector<72x324xf32>, vector<8x324xf32> -> vector<8x324xf32>
    %c0_4 = arith.constant 0 : index
    %c0_5 = arith.constant 0 : index
    %14 = vector.load %arg3[%c0_4, %c0_5] : memref<1x324xf32, #tpu.memory_space<vmem>>, vector<1x324xf32>
    %15 = vector.broadcast %14 : vector<1x324xf32> to vector<8x324xf32>
    %16 = arith.mulf %13, %15 : vector<8x324xf32>
    %cst_6 = arith.constant dense<0.000000e+00> : vector<8xf32>
    %17 = vector.multi_reduction <add>, %16, %cst_6 [1] : vector<8x324xf32> to vector<8xf32>
    %18 = vector.shape_cast %17 : vector<8xf32> to vector<8x1xf32>
    %cst_7 = arith.constant 3.906250e-03 : f32
    %19 = vector.broadcast %cst_7 : f32 to vector<8x1xf32>
    %20 = arith.mulf %18, %19 : vector<8x1xf32>
    %21 = arith.mulf %16, %13 : vector<8x324xf32>
    %cst_8 = arith.constant dense<0.000000e+00> : vector<8xf32>
    %22 = vector.multi_reduction <add>, %21, %cst_8 [1] : vector<8x324xf32> to vector<8xf32>
    %23 = vector.shape_cast %22 : vector<8xf32> to vector<8x1xf32>
    %cst_9 = arith.constant 3.906250e-03 : f32
    %24 = vector.broadcast %cst_9 : f32 to vector<8x1xf32>
    %25 = arith.mulf %23, %24 : vector<8x1xf32>
    %26 = arith.mulf %20, %20 : vector<8x1xf32>
    %27 = arith.subf %25, %26 : vector<8x1xf32>
    %c0_10 = arith.constant 0 : index
    %c0_11 = arith.constant 0 : index
    %28 = vector.load %arg5[%c0_10, %c0_11] : memref<8x1xf32, #tpu.memory_space<vmem>>, vector<8x1xf32>
    %cst_12 = arith.constant 9.99999974E-6 : f32
    %29 = vector.broadcast %cst_12 : f32 to vector<8x1xf32>
    %30 = arith.addf %27, %29 : vector<8x1xf32>
    %31 = math.rsqrt %30 : vector<8x1xf32>
    %32 = arith.mulf %28, %31 : vector<8x1xf32>
    %c0_13 = arith.constant 0 : index
    %c0_14 = arith.constant 0 : index
    %33 = vector.load %arg6[%c0_13, %c0_14] : memref<8x1xf32, #tpu.memory_space<vmem>>, vector<8x1xf32>
    %34 = arith.mulf %20, %32 : vector<8x1xf32>
    %35 = arith.subf %33, %34 : vector<8x1xf32>
    %36 = vector.broadcast %32 : vector<8x1xf32> to vector<8x324xf32>
    %37 = arith.mulf %13, %36 : vector<8x324xf32>
    %38 = vector.broadcast %35 : vector<8x1xf32> to vector<8x324xf32>
    %39 = arith.addf %37, %38 : vector<8x324xf32>
    %cst_15 = arith.constant 0.000000e+00 : f32
    %40 = vector.broadcast %cst_15 : f32 to vector<8x324xf32>
    %41 = arith.maximumf %39, %40 : vector<8x324xf32>
    %c0_16 = arith.constant 0 : index
    %c0_17 = arith.constant 0 : index
    %42 = vector.load %arg4[%c0_16, %c0_17] : memref<324x64xf32, #tpu.memory_space<vmem>>, vector<324x64xf32>
    %cst_18 = arith.constant dense<0.000000e+00> : vector<8x64xf32>
    %43 = tpu.matmul %41, %42, %cst_18 {dimension_numbers = #tpu.dot_dimension_numbers<[1], [0], [0], [1], [0, 0, 1, 1], [], []>} : vector<8x324xf32>, vector<324x64xf32>, vector<8x64xf32> -> vector<8x64xf32>
    %c0_19 = arith.constant 0 : index
    %c0_20 = arith.constant 0 : index
    %c0_21 = arith.constant 0 : index
    %44 = vector.load %arg7[%c0_19, %c0_20, %c0_21] : memref<1x8x64xf32, #tpu.memory_space<vmem>>, vector<1x8x64xf32>
    %45 = vector.shape_cast %44 : vector<1x8x64xf32> to vector<8x64xf32>
    %46 = vector.shape_cast %43 : vector<8x64xf32> to vector<1x8x64xf32>
    tpu.vector_store %arg7[%c0_19, %c0_20, %c0_21], %46 {strides = array<i32>} : memref<1x8x64xf32, #tpu.memory_space<vmem>>, vector<1x8x64xf32>,
    return
  }
  func.func @transform_0(%arg0: i32) -> (i32, i32, i32) {
    %c0_i32 = arith.constant 0 : i32
    %c0_i32_0 = arith.constant 0 : i32
    %c0_i32_1 = arith.constant 0 : i32
    return %arg0, %c0_i32, %c0_i32_0 : i32, i32, i32
  }
  func.func @transform_1(%arg0: i32) -> (i32, i32) {
    %c0_i32 = arith.constant 0 : i32
    %c0_i32_0 = arith.constant 0 : i32
    %c0_i32_1 = arith.constant 0 : i32
    return %c0_i32, %c0_i32_0 : i32, i32
  }
  func.func @transform_2(%arg0: i32) -> (i32, i32) {
    %c0_i32 = arith.constant 0 : i32
    %c0_i32_0 = arith.constant 0 : i32
    %c0_i32_1 = arith.constant 0 : i32
    return %c0_i32, %c0_i32_0 : i32, i32
  }
  func.func @transform_3(%arg0: i32) -> (i32, i32) {
    %c0_i32 = arith.constant 0 : i32
    %c0_i32_0 = arith.constant 0 : i32
    %c0_i32_1 = arith.constant 0 : i32
    return %c0_i32, %c0_i32_0 : i32, i32
  }
  func.func @transform_4(%arg0: i32) -> (i32, i32) {
    %c0_i32 = arith.constant 0 : i32
    %c0_i32_0 = arith.constant 0 : i32
    %c0_i32_1 = arith.constant 0 : i32
    return %c0_i32, %c0_i32_0 : i32, i32
  }
  func.func @transform_5(%arg0: i32) -> (i32, i32) {
    %c0_i32 = arith.constant 0 : i32
    %c0_i32_0 = arith.constant 0 : i32
    %c0_i32_1 = arith.constant 0 : i32
    return %c0_i32, %c0_i32_0 : i32, i32
  }
  func.func @transform_6(%arg0: i32) -> (i32, i32, i32) {
    %c0_i32 = arith.constant 0 : i32
    %c0_i32_0 = arith.constant 0 : i32
    %c0_i32_1 = arith.constant 0 : i32
    return %arg0, %c0_i32, %c0_i32_0 : i32, i32, i32
  }
}

</mosaic_0001>

<bundles_post_ra>
// kernel: tpu_custom_call.1
= control target key start
LH: loop header
LB: loop body
LE: loop exit
PB: predicated region body
PF: predicated region fallthrough
CT: control target
= control target key end

     0   :  { %11 = vsyncpa [#allocation3], 0  ;;  %s1164_s0 = inlined_call_operand.vmem [shape: f32[2,8,384], index: 0, kind: input, shape index: {}]   ;;  %s1165_s1 = inlined_call_operand.vmem [shape: f32[8,72], index: 1, kind: input, shape index: {}]   ;;  %s1166_s2 = inlined_call_operand.vmem [shape: f32[1,324], index: 2, kind: input, shape index: {}]   ;;  %s1167_s3 = inlined_call_operand.vmem [shape: f32[324,64], index: 3, kind: input, shape index: {}]   ;;  %s1168_s4 = inlined_call_operand.vmem [shape: f32[8,1], index: 4, kind: input, shape index: {}]   ;;  %s1169_s5 = inlined_call_operand.vmem [shape: f32[8,1], index: 5, kind: input, shape index: {}]   ;;  %s1170_s6 = inlined_call_operand.hbm [shape: f32[2,8,64], index: 6, kind: output, shape index: {}]  }
   0x1   :  { %13 = vsyncpa [#allocation3 + $0x1], 0  ;;  %s881_s21 = smov 0   ;;  %s883_s22 = smov 0  }
   0x2   :  { %s885_s23 = smov 0   ;;  %s887_s24 = smov 0  }
   0x3 LB: > { %s902_s25 = sadd.s32 4294967295, %s835_s24   ;;  %s666_s26 = sadd.s32 4294967294, %s835_s24   ;;  %s835_s24 = sphi %s887_s24, %s1176_s24   ;;  %s831_s23 = sphi %s885_s23, %s1175_s23   ;;  %s827_s22 = sphi %s883_s22, %s1174_s22   ;;  %s823_s21 = sphi %s881_s21, %s1173_s21  }
   0x4   : > { %s906_s27 = sadd.s32 1, %s835_s24   ;;  %s157_s28 = sadd.s32 1, %s831_s23 }
   0x5   : > { %s154_s29 = ssub.s32 %s835_s24, %s906_s27  ;;  %p167_p0 = scmp.ne.s32.totalorder %s831_s23, %s827_s22 }
   0x6   : > { %p155_p1 = scmp.eq.s32.totalorder %s154_s29, 0  ;;  %p168_p2 = scmp.eq.s32.totalorder %s902_s25, 1 }
   0x7   : > { %p173_p3 = scmp.ne.s32.totalorder %s827_s22, %s823_s21  ;;  %p174_p4 = scmp.eq.s32.totalorder %s666_s26, 1 }
   0x8   : > { %s917_s30 = scalar_select %p155_p1, %s831_s23, %s157_s28  }
   0x9   : > { %p919_p5 = por %p168_p2, %p167_p0  ;;  %p923_p6 = por %p174_p4, %p173_p3 }
   0xa   : > { %p669_p7 = scmp.ge.s32.totalorder %s835_s24, 1  ;;  %p215_p8 = scmp.lt.s32.totalorder %s835_s24, 3 }
   0xc   : > { %p216_p9 = pnand %p669_p7, %p215_p8 }
   0xd   : > { %p245_p10 = scmp.lt.s32.totalorder (!%p216_p9), %s902_s25, 1  ;;  %s837_s14 = smov (!%p216_p9), 92  }
   0xe   : > { %219 = sbr.rel (%p216_p9) target bundleno = 737 (0x2e1), region = 44  ;;  %s838_s15 = smov (!%p216_p9), 90  }
   0xf   : > { %s839_s16 = smov (!%p216_p9), 109   ;;  %s840_s17 = smov (!%p216_p9), 108  }
  0x10   : > { %s841_s18 = smov (!%p216_p9), 91   ;;  %s842_s19 = smov (!%p216_p9), 110  }
  0x11   : > { %s843_s20 = smov (!%p216_p9), 126   ;;  %s844_s26 = smov (!%p216_p9), 127  }
  0x12   : > { %s242_s28 = sand.u32 (!%p216_p9), 1, %s827_s22  }
  0x13   : > { %s246_s9 = scalar_select %p245_p10, %s902_s25, 1  ;;  %vm346_vm0 = vcmask 736256   ;;  %vm334_vm1 = vcmask 744448   ;;  %vm322_vm2 = vcmask 752640   ;;  %vm310_vm3 = vcmask 883712   ;;  %v352_v44 = vld [vmem:[%s1165_s1] sm:$0xff] }
  0x14   : > { %vm298_vm4 = vcmask 891904   ;;  %vm286_vm5 = vcmask 900096   ;;  %vm274_vm6 = vcmask 1031168   ;;  %vm262_vm7 = vcmask 1039360   ;;  %v417_v53 = vld [vmem:[%s1166_s2] sm:$0x7] }
  0x15   : > { %s681_s10 = smul.u32 24, %s246_s9  ;;  %vm353_vm8 = vcmask 588800   ;;  %v419_v55 = vperm.slane %v417_v53, 0  ;;  %v420_v56 = vperm.slane %v417_v53, 1  ;;  %v421_v60 = vperm.slane %v417_v53, 2  ;;  %v518_v53 = vld [vmem:[%s1167_s3 + $0x128] sm:$0xff] }
  0x16   : > { %vm429_vm9 = vcmask 556032   ;;  %vm525_vm10 = vcmask 1043456   ;;  %s670_s29 = sshll.u32 %s242_s28, 3  ;;  %s678_s9 = sshll.u32 %s902_s25, 3  ;;  %vm589_vm14 = vcmask 523264  }
  0x17   : > { %s249_s13 = scalar_lea.vmem %s1164_s0, %s681_s10  ;;  %s602_s12 = scalar_lea.hbm %s1170_s6, %s678_s9 }
  0x18   : > { %v934_v0 = vld [vmem:[%s249_s13] sm:$0xff]  ;;  %v936_v1 = vld [vmem:[%s249_s13 + $0x8] sm:$0xff]  ;;  %v940_v3 = vld [vmem:[%s249_s13 + $0x10] sm:$0xff]  ;;  %s244_s13 = scalar_lea.vmem [#allocation2], %s670_s29 }
  0x19   : > { %v740_v2 = vpack.i.bf16 %v936_v1, %v934_v0 }
  0x1b   : > { %741 = vrot.lane.b32.xlu1 %v740_v2, %s837_s14  ;;  %731 = vrot.lane.b32.xlu0 %v740_v2, %s838_s15 }
  0x1c   : > { %751 = vrot.lane.b32.xlu2 %v740_v2, %s839_s16 }
  0x23   : > { %746 = vrot.lane.b32.xlu1 %v740_v2, %s840_s17  ;;  %736 = vrot.lane.b32.xlu0 %v740_v2, %s841_s18 }
  0x24   : > { %344 = vrot.lane.b32.xlu2 %v940_v3, %s838_s15  ;;  %s606_s15 = sshll.u32 %s602_s12, 4  ;;  %s607_s15 = int_to_ptr.hbm [resolvable:$true] %s606_s15 }
  0x2b   : > { %332 = vrot.lane.b32.xlu1 %v940_v3, %s841_s18  ;;  %756 = vrot.lane.b32.xlu0 %v740_v2, %s842_s19 }
  0x2c   : > { %761 = vrot.lane.b32.xlu2 %v740_v2, %s843_s20 }
  0x33   : > { %766 = vrot.lane.b32.xlu1 %v740_v2, %s844_s26  ;;  %320 = vrot.lane.b32.xlu0 %v940_v3, %s837_s14  ;;  %s604_s14 = sshll.u32 %s244_s13, 4  ;;  %s605_s14 = int_to_ptr.vmem [resolvable:$true] %s604_s14 }
  0x34   : > { %308 = vrot.lane.b32.xlu2 %v940_v3, %s840_s17  ;;  %s787_s17 = sshra.s32 %s607_s15, 4  ;;  %s788_s17 = int_to_ptr.hbm [resolvable:$true] %s787_s17 }
  0x35   : > { %s789_s25 = scalar_lea.hbm %s788_s17, 8  ;;  %p794_p0 = scmp.lt.s32.totalorder %s788_s17, %s1170_s6 }
  0x36   : > { %p790_p11 = scmp.ne.s32.totalorder %s788_s17, %s789_s25 }
  0x38   : > { %p791_p12 = pnand %p790_p11, %p919_p5 }
  0x3a   : > { %p792_p13 = pneg %p791_p12 }
  0x3b   : > { %284 = vrot.lane.b32.xlu1 %v940_v3, %s842_s19  ;;  %296 = vrot.lane.b32.xlu0 %v940_v3, %s839_s16  ;;  %s592_s16 = scalar_lea.sflag [#allocation3], %s242_s28 }
  0x3c   : > { %272 = vrot.lane.b32.xlu2 %v940_v3, %s843_s20  ;;  %s793_s20 = scalar_lea.hbm %s1170_s6, 16 }
  0x3d   : > { %p795_p1 = scmp.lt.s32.totalorder %s793_s20, %s789_s25 }
  0x3f   : > { %p796_p2 = por %p795_p1, %p794_p0 }
  0x41   : > { %p797_p3 = pnand %p796_p2, %p792_p13 }
  0x43   : > { %260 = vrot.lane.b32.xlu0 %v940_v3, %s844_s26 }
  0x76   : > { %v950_v4 = vpop.permute.xlu2 %751 }
  0x77   : > { %v754_v21 = vunpack.i.h.bf16 %v950_v4  ;;  %v753_v22 = vunpack.i.l.bf16 %v950_v4 }
  0x79   : > { %v299_v32 = vsel %vm298_vm4, %v753_v22, %v754_v21  ;;  %v493_v22 = vld [vmem:[%s1167_s3 + $0x60] sm:$0xff] }
  0x7e   : > { %v345_v9 = vpop.permute.xlu2 %344 }
  0x86   : > { %v762_v23 = vpop.permute.xlu2 %761 }
  0x87   : > { %v764_v25 = vunpack.i.h.bf16 %v762_v23  ;;  %v763_v26 = vunpack.i.l.bf16 %v762_v23  ;;  %v509_v23 = vld [vmem:[%s1167_s3 + $0xe0] sm:$0xff] }
  0x89   : > { %v275_v35 = vsel %vm274_vm6, %v763_v26, %v764_v25  ;;  %v508_v26 = vld [vmem:[%s1167_s3 + $0xd8] sm:$0xff] }
  0x8d   : > { %v742_v5 = vpop.permute.xlu1 %741  ;;  %v732_v6 = vpop.permute.xlu0 %731 }
  0x8e   : > { %v734_v7 = vunpack.i.h.bf16 %v732_v6  ;;  %v733_v8 = vunpack.i.l.bf16 %v732_v6  ;;  %v744_v14 = vunpack.i.h.bf16 %v742_v5  ;;  %v743_v15 = vunpack.i.l.bf16 %v742_v5  ;;  %v309_v36 = vpop.permute.xlu2 %308 }
  0x90   : > { %v347_v10 = vsel %vm346_vm0, %v733_v8, %v734_v7  ;;  %v348_v11 = vsel %vm346_vm0, %v734_v7, %v345_v9  ;;  %v323_v24 = vsel %vm322_vm2, %v743_v15, %v744_v14  ;;  %v845_v8 = vmov 0   ;;  %v496_v15 = vld [vmem:[%s1167_s3 + $0x78] sm:$0xff] }
  0x91   : > { %364 = vmatpush.msra.mxu2 %v347_v10  ;;  %384 = vmatpush.msra.mxu1 %v348_v11 }
  0x92   : > { %770 = vset.pattern.permute.xlu0 %v845_v8  ;;  %529 = vmatpush.msra.mxu3 %v496_v15 }
  0x95   : > { %v747_v12 = vpop.permute.xlu1 %746  ;;  %v737_v13 = vpop.permute.xlu0 %736 }
  0x96   : > { %v739_v16 = vunpack.i.h.bf16 %v737_v13  ;;  %v738_v17 = vunpack.i.l.bf16 %v737_v13  ;;  %v749_v18 = vunpack.i.h.bf16 %v747_v12  ;;  %v748_v19 = vunpack.i.l.bf16 %v747_v12  ;;  %v273_v48 = vpop.permute.xlu2 %272 }
  0x97   : > { %v276_v50 = vsel %vm274_vm6, %v764_v25, %v273_v48  ;;  %v492_v25 = vld [vmem:[%s1167_s3 + $0x58] sm:$0xff] }
  0x98   : > { %v335_v20 = vsel %vm334_vm1, %v738_v17, %v739_v16  ;;  %v311_v27 = vsel %vm310_vm3, %v748_v19, %v749_v18  ;;  %v312_v43 = vsel %vm310_vm3, %v749_v18, %v309_v36  ;;  %v495_v17 = vld [vmem:[%s1167_s3 + $0x70] sm:$0xff] }
  0x99   : > { %365 = vmatpush.msra.mxu2 %v335_v20  ;;  %v511_v18 = vld [vmem:[%s1167_s3 + $0xf0] sm:$0xff]  ;;  %v494_v20 = vld [vmem:[%s1167_s3 + $0x68] sm:$0xff]  ;;  %530 = vmatpush.msra.mxu3 %v495_v17 }
  0x9b   : > { %366 = vmatpush.msra.mxu2 %v323_v24  ;;  %531 = vmatpush.msra.mxu3 %v494_v20  ;;  %v521_v24 = vld [vmem:[%s1167_s3 + $0x140] sm:$0xf] }
  0x9d   : > { %v333_v28 = vpop.permute.xlu1 %332  ;;  %v757_v29 = vpop.permute.xlu0 %756  ;;  %367 = vmatpush.msra.mxu2 %v311_v27  ;;  %v520_v27 = vld [vmem:[%s1167_s3 + $0x138] sm:$0xff]  ;;  %532 = vmatpush.msra.mxu3 %v493_v22 }
  0x9e   : > { %v759_v30 = vunpack.i.h.bf16 %v757_v29  ;;  %v758_v31 = vunpack.i.l.bf16 %v757_v29  ;;  %v336_v33 = vsel %vm334_vm1, %v739_v16, %v333_v28  ;;  %v512_v16 = vld [vmem:[%s1167_s3 + $0xf8] sm:$0xff]  ;;  %v491_v29 = vld [vmem:[%s1167_s3 + $0x50] sm:$0xff] }
  0x9f   : > { %368 = vmatpush.msra.mxu2 %v299_v32  ;;  %385 = vmatpush.msra.mxu1 %v336_v33  ;;  %v490_v32 = vld [vmem:[%s1167_s3 + $0x48] sm:$0xff] }
  0xa0   : > { %v287_v34 = vsel %vm286_vm5, %v758_v31, %v759_v30  ;;  %549 = vmatpush.msra.mxu0 %v512_v16  ;;  %533 = vmatpush.msra.mxu3 %v492_v25  ;;  %v506_v33 = vld [vmem:[%s1167_s3 + $0xc8] sm:$0xff] }
  0xa1   : > { %369 = vmatpush.msra.mxu2 %v287_v34 }
  0xa2   : > { %550 = vmatpush.msra.mxu0 %v511_v18  ;;  %534 = vmatpush.msra.mxu3 %v491_v29 }
  0xa3   : > { %370 = vmatpush.msra.mxu2 %v275_v35  ;;  %v489_v35 = vld [vmem:[%s1167_s3 + $0x40] sm:$0xff] }
  0xa4   : > { %535 = vmatpush.msra.mxu3 %v490_v32 }
  0xa5   : > { %v767_v37 = vpop.permute.xlu1 %766  ;;  %v321_v38 = vpop.permute.xlu0 %320 }
  0xa6   : > { %v769_v39 = vunpack.i.h.bf16 %v767_v37  ;;  %v768_v40 = vunpack.i.l.bf16 %v767_v37  ;;  %v324_v41 = vsel %vm322_vm2, %v744_v14, %v321_v38  ;;  %536 = vmatpush.msra.mxu3 %v489_v35 }
  0xa7   : > { %386 = vmatpush.msra.mxu1 %v324_v41  ;;  %v487_v41 = vld [vmem:[%s1167_s3 + $0x30] sm:$0xff] }
  0xa8   : > { %v263_v42 = vsel %vm262_vm7, %v768_v40, %v769_v39 }
  0xa9   : > { %371 = vmatpush.msra.mxu2 %v263_v42  ;;  %387 = vmatpush.msra.mxu1 %v312_v43  ;;  %v503_v42 = vld [vmem:[%s1167_s3 + $0xb0] sm:$0xff] }
  0xab   : > { %372 = vmatpush.msra.mxu2 %v934_v0 }
  0xac   : > { %672 = vmatmul.msk.f32.vlgmr.msra.gmra.mxu2 %vm353_vm8, %v352_v44 }
  0xad   : > { %404 = vmatpush.msrb.mxu2 %v345_v9  ;;  %v285_v45 = vpop.permute.xlu1 %284  ;;  %v297_v46 = vpop.permute.xlu0 %296 }
  0xae   : > { %v300_v47 = vsel %vm298_vm4, %v754_v21, %v297_v46  ;;  %v288_v49 = vsel %vm286_vm5, %v759_v30, %v285_v45  ;;  %v510_v21 = vld [vmem:[%s1167_s3 + $0xe8] sm:$0xff]  ;;  %v507_v30 = vld [vmem:[%s1167_s3 + $0xd0] sm:$0xff] }
  0xaf   : > { %405 = vmatpush.msrb.mxu2 %v333_v28  ;;  %388 = vmatpush.msra.mxu1 %v300_v47  ;;  %v519_v28 = vld [vmem:[%s1167_s3 + $0x130] sm:$0xff] }
  0xb0   : > { %551 = vmatpush.msra.mxu0 %v510_v21 }
  0xb1   : > { %406 = vmatpush.msrb.mxu2 %v321_v38  ;;  %389 = vmatpush.msra.mxu1 %v288_v49  ;;  %v488_v38 = vld [vmem:[%s1167_s3 + $0x38] sm:$0xff]  ;;  %v459_v49 = vld [vmem:[%s1169_s5] sm:$0xff] }
  0xb2   : > { %552 = vmatpush.msra.mxu0 %v509_v23  ;;  %537 = vmatpush.msra.mxu3 %v488_v38 }
  0xb3   : > { %407 = vmatpush.msrb.mxu2 %v309_v36  ;;  %390 = vmatpush.msra.mxu1 %v276_v50  ;;  %v505_v36 = vld [vmem:[%s1167_s3 + $0xc0] sm:$0xff] }
  0xb4   : > { %553 = vmatpush.msra.mxu0 %v508_v26  ;;  %538 = vmatpush.msra.mxu3 %v487_v41 }
  0xb5   : > { %408 = vmatpush.msrb.mxu2 %v297_v46  ;;  %v261_v51 = vpop.permute.xlu0 %260 }
  0xb6   : > { %v264_v52 = vsel %vm262_vm7, %v769_v39, %v261_v51  ;;  %554 = vmatpush.msra.mxu0 %v507_v30  ;;  %v504_v39 = vld [vmem:[%s1167_s3 + $0xb8] sm:$0xff] }
  0xb7   : > { %409 = vmatpush.msrb.mxu2 %v285_v45  ;;  %391 = vmatpush.msra.mxu1 %v264_v52  ;;  %v502_v52 = vld [vmem:[%s1167_s3 + $0xa8] sm:$0xff] }
  0xb8   : > { %555 = vmatpush.msra.mxu0 %v506_v33 }
  0xb9   : > { %410 = vmatpush.msrb.mxu2 %v273_v48  ;;  %392 = vmatpush.msra.mxu1 %v936_v1 }
  0xba   : > { %673 = vmatmul.msk.f32.vlgmr.msra.gmra.mxu1 %vm353_vm8, %v352_v44  ;;  %556 = vmatpush.msra.mxu0 %v505_v36 }
  0xbb   : > { %411 = vmatpush.msrb.mxu2 %v261_v51  ;;  %675 = vmatpush.msk.msrb.mxu1 %vm525_vm10, %v521_v24  ;;  %v486_v51 = vld [vmem:[%s1167_s3 + $0x28] sm:$0xff] }
  0xbc   : > { %557 = vmatpush.msra.mxu0 %v504_v39  ;;  %539 = vmatpush.msra.mxu3 %v486_v51 }
  0xbd   : > { %412 = vmatpush.msrb.mxu2 %v940_v3  ;;  %577 = vmatpush.msrb.mxu1 %v520_v27 }
  0xbe   : > { %674 = vmatmul.msk.f32.vlgmr.msrb.gmra.mxu2 %vm353_vm8, %v352_v44  ;;  %v446_v44 = vld [vmem:[%s1168_s4] sm:$0xff]  ;;  %558 = vmatpush.msra.mxu0 %v503_v42 }
  0xbf   : > { %578 = vmatpush.msrb.mxu1 %v519_v28 }
  0xc0   : > { %559 = vmatpush.msra.mxu0 %v502_v52 }
  0xc1   : > { %579 = vmatpush.msrb.mxu1 %v518_v53 }
 0x12f   : > { %v980_v54 = vpop.f32.mrf.mxu2 }
 0x130   : > { %v425_v58 = vmul.f32 %v419_v55, %v980_v54  ;;  %v485_v55 = vld [vmem:[%s1167_s3 + $0x20] sm:$0xff] }
 0x131   : > { %540 = vmatpush.msra.mxu3 %v485_v55 }
 0x132   : > { %v435_v61 = vmul.f32 %v425_v58, %v980_v54 }
 0x137   : > { %v982_v57 = vpop.f32.mrf.mxu1 }
 0x138   : > { %v426_v59 = vmul.f32 %v420_v56, %v982_v57  ;;  %v501_v56 = vld [vmem:[%s1167_s3 + $0xa0] sm:$0xff] }
 0x139   : > { %560 = vmatpush.msra.mxu0 %v501_v56 }
 0x13a   : > { %v436_v62 = vmul.f32 %v426_v59, %v982_v57  ;;  %v428_v1 = vadd.f32 %v426_v59, %v425_v58  ;;  %v517_v58 = vld [vmem:[%s1167_s3 + $0x120] sm:$0xff]  ;;  %v484_v59 = vld [vmem:[%s1167_s3 + $0x18] sm:$0xff] }
 0x13b   : > { %580 = vmatpush.msrb.mxu1 %v517_v58  ;;  %541 = vmatpush.msra.mxu3 %v484_v59 }
 0x13c   : > { %v438_v5 = vadd.f32 %v436_v62, %v435_v61  ;;  %v516_v61 = vld [vmem:[%s1167_s3 + $0x118] sm:$0xff]  ;;  %v483_v62 = vld [vmem:[%s1167_s3 + $0x10] sm:$0xff] }
 0x13d   : > { %581 = vmatpush.msrb.mxu1 %v516_v61  ;;  %542 = vmatpush.msra.mxu3 %v483_v62 }
 0x141   : > { %v988_v63 = vpop.f32.mrf.mxu2 }
 0x142   : > { %v427_v0 = vmul.f32 %v421_v60, %v988_v63  ;;  %v500_v60 = vld [vmem:[%s1167_s3 + $0x98] sm:$0xff] }
 0x143   : > { %561 = vmatpush.msra.mxu0 %v500_v60 }
 0x144   : > { %v437_v2 = vmul.f32 %v427_v0, %v988_v63  ;;  %v430_v3 = vsel %vm429_vm9, %v427_v0, 0.0  ;;  %v499_v0 = vld [vmem:[%s1167_s3 + $0x90] sm:$0xff] }
 0x145   : > { %v431_v4 = vadd.f32 %v430_v3, %v428_v1  ;;  %v515_v1 = vld [vmem:[%s1167_s3 + $0x110] sm:$0xff]  ;;  %562 = vmatpush.msra.mxu0 %v499_v0  ;;  %v498_v3 = vld [vmem:[%s1167_s3 + $0x88] sm:$0xff] }
 0x146   : > { %v439_v6 = vsel %vm429_vm9, %v437_v2, 0.0  ;;  %582 = vmatpush.msrb.mxu1 %v515_v1  ;;  %v482_v2 = vld [vmem:[%s1167_s3 + $0x8] sm:$0xff] }
 0x147   : > { %432 = vadd.xlane.f32.xlu1 %v431_v4  ;;  %v440_v7 = vadd.f32 %v439_v6, %v438_v5  ;;  %v514_v4 = vld [vmem:[%s1167_s3 + $0x108] sm:$0xff]  ;;  %543 = vmatpush.msra.mxu3 %v482_v2  ;;  %v481_v5 = vld [vmem:[%s1167_s3] sm:$0xff] }
 0x148   : > { %563 = vmatpush.msra.mxu0 %v498_v3  ;;  %583 = vmatpush.msrb.mxu1 %v514_v4  ;;  %v497_v6 = vld [vmem:[%s1167_s3 + $0x80] sm:$0xff] }
 0x149   : > { %441 = vadd.xlane.f32.xlu2 %v440_v7  ;;  %v513_v7 = vld [vmem:[%s1167_s3 + $0x100] sm:$0xff]  ;;  %544 = vmatpush.msra.mxu3 %v481_v5 }
 0x14a   : > { %564 = vmatpush.msra.mxu0 %v497_v6  ;;  %584 = vmatpush.msrb.mxu1 %v513_v7 }
 0x1ba   : > { %v433_v9 = vpop.xlane.xlu1 %432 }
 0x1bb   : > { %v994_v10 = vmul.f32 0.00390625, %v433_v9 }
 0x1bc   : > { %v442_v11 = vpop.xlane.xlu2 %441 }
 0x1bd   : > { %v444_v12 = vmul.f32 %v994_v10, %v994_v10  ;;  %v443_v13 = vmul.f32 0.00390625, %v442_v11 }
 0x1bf   : > { %v445_v14 = vsub.f32 %v443_v13, %v444_v12 }
 0x1c1   : > { %v447_v19 = vadd.f32 1e-05, %v445_v14 }
 0x1c3   : > { %771 = vrsqrt.f32 %v447_v19  ;;  %vm454_vm12 = vweird.f32 %v447_v19 }
 0x1c9   : > { %v772_v31 = vpop.eup %771 }
 0x1ca   : > { %v449_v34 = vmul.f32 %v772_v31, %v447_v19  ;;  %vm455_vm11 = vweird.f32 %v772_v31 }
 0x1cb   : > { %vm456_vm13 = vmor %vm454_vm12, %vm455_vm11 }
 0x1cc   : > { %v450_v37 = vmul.f32 %v772_v31, %v449_v34 }
 0x1ce   : > { %v451_v40 = vmul.f32 0.5, %v450_v37 }
 0x1d0   : > { %v452_v43 = vsub.f32 1.5, %v451_v40 }
 0x1d2   : > { %v453_v45 = vmul.f32 %v772_v31, %v452_v43 }
 0x1d4   : > { %v457_v46 = vsel %vm456_vm13, %v772_v31, %v453_v45 }
 0x1d5   : > { %v458_v47 = vmul.f32 %v457_v46, %v446_v44 }
 0x1d7   : > { %464 = vperm.xlu0 %770, %v458_v47   ;;  %v460_v48 = vmul.f32 %v458_v47, %v994_v10 }
 0x1d9   : > { %v461_v50 = vsub.f32 %v459_v49, %v460_v48 }
 0x1df   : > { %472 = vperm.xlu0 %770, %v461_v50  }
 0x249   : > { %v465_v8 = vpop.permute.xlu0 %464 }
 0x24a   : > { %v467_v9 = vmul.f32 %v465_v8, %v980_v54  ;;  %v468_v10 = vmul.f32 %v465_v8, %v982_v57  ;;  %v469_v11 = vmul.f32 %v465_v8, %v988_v63 }
 0x251   : > { %v473_v12 = vpop.permute.xlu0 %472 }
 0x252   : > { %v475_v13 = vadd.f32 %v473_v12, %v467_v9  ;;  %v476_v14 = vadd.f32 %v473_v12, %v468_v10  ;;  %v477_v15 = vadd.f32 %v473_v12, %v469_v11 }
 0x254   : > { %v480_v16 = vmax.f32 %v477_v15, 0.0  ;;  %v478_v17 = vmax.f32 %v475_v13, 0.0  ;;  %v479_v18 = vmax.f32 %v476_v14, 0.0 }
 0x256   : > { %545 = vmatmul.f32.vlgmr.msra.gmra.mxu3 %v478_v17  ;;  %565 = vmatmul.f32.vlgmr.msra.gmra.mxu0 %v479_v18 }
 0x257   : > { %676 = vmatmul.msk.f32.vlgmr.msrb.gmra.mxu1 %vm429_vm9, %v480_v16 }
 0x2d3   : > { %v566_v54 = vpop.f32.mrf.mxu0 }
 0x2d4   : > { %v586_v19 = vpop.f32.mrf.mxu1 }
 0x2d9   : > { %v546_v57 = vpop.f32.mrf.mxu3 }
 0x2da   : > { %v567_v63 = vadd.f32 %v566_v54, %v546_v57 }
 0x2dc   : > { %v587_v20 = vadd.f32 %v586_v19, %v567_v63 }
 0x2de   : > { %590 = vst.msk [vmem:[%s244_s13] sm:$0xff] %vm589_vm14, %v587_v20 }
 0x2df   : > { %800 = shalt.err (!%p797_p3)
}
 0x2e0   : > { %682 = dma.vmem_to_hbm [thread:$0]  (%p919_p5), %s605_s14, 128, %s607_s15, %s592_s16  }
 0x2e1 PF: > { %p688_p4 = scmp.ge.s32.totalorder %s835_s24, 2  ;;  %s618_s28 = sand.u32 1, %s823_s21  }
 0x2e2   : > { %s619_s9 = scalar_lea.sflag [#allocation3], %s618_s28 }
 0x2e3   : > { %p685_p7 = pnand %p688_p4, %p923_p6 }
 0x2e5   : > { %p686_p8 = pneg %p685_p7 }
 0x2e7   : > { %818 = dma.done.wait (%p686_p8), %s619_s9, 128  }
 0x2e8   : > { %820 = vsyncadd (%p686_p8), %s619_s9, 4294967168  ;;  %p16_p9 = scmp.ge.s32.totalorder %s906_s27, 4   ;;  %s1173_s21 = smov %s827_s22 }
 0x2e9   : > { %s1174_s22 = smov %s831_s23  ;;  %s1175_s23 = smov %s917_s30 }
 0x2ea   : > { %s1176_s24 = smov %s906_s27  ;;  %18 = sbr.rel (!%p16_p9) target bundleno = 3 (0x3), region = 79 }
 0x2ef   :  { %625 = vsyncpa [#allocation3], 1 }
 0x2f0   :  { %627 = vsyncpa [#allocation3 + $0x1], 1 }

</bundles_post_ra>
